<compile_context>
chip_gen: v7x
topology: tpu7x:2x2x1
jax: 0.10.0
libtpu: 0.0.40
codegen_flags: <defaults>
</compile_context>

<pallas_src>
import math
import numpy as np

import jax
import jax.numpy as jnp
from jax.experimental import pallas as pl
from jax.experimental.pallas import tpu as pltpu


LANE = 128
MAX_TILE_ROWS = 2048  # 2048 rows x 128 lanes = 256K points per grid step


def _cdiv(a: int, b: int) -> int:
    return (a + b - 1) // b


def _round_up(a: int, b: int) -> int:
    return _cdiv(a, b) * b


def _is_pow2(v: int) -> bool:
    return v > 0 and (v & (v - 1)) == 0


def _make_keys_kernel(B_sparse: int, n2: int, m2: int, n1: int, m1: int):
    """Pallas kernel computing vx/vy/vx_shift/vy_shift per point.

    Input ref:  (3, R_TILE, 128) int32, channels = [batch, y, x]
    Output ref: (4, R_TILE, 128) int32, channels = [vx, vy, vx_shift, vy_shift]
    """
    N2, M2, N1, M1 = 2 * n2, 2 * m2, 2 * n1, 2 * m1
    N2M2 = N2 * M2                      # baked Python constants
    M2N2 = M2 * N2
    batch_coef = B_sparse * B_sparse * 10
    shift_x, shift_y = n2 // 2, m2 // 2

    pow2_x = _is_pow2(n2)
    pow2_y = _is_pow2(m2)
    log2_n2 = n2.bit_length() - 1
    log2_m2 = m2.bit_length() - 1

    # TODO(synk): key arithmetic is int32 (torch reference is int64); guarded
    # by a bound assert in the wrapper, but very large sparse shapes / batch
    # counts would need an int64 / two-key path.

    def sgn(t, m):
        # m is 0 (keep) or -1 (negate): (t ^ -1) - (-1) == -t ; xor/sub only.
        return (t ^ m) - m

    def kernel(c_ref, o_ref):
        b = c_ref[0]                    # (R_TILE, 128) batch index
        y = c_ref[1]                    # coords[:, 2]
        x = c_ref[2]                    # coords[:, 3]
        boff = b * batch_coef           # hoisted: shared by all four keys

        def keys(xc, yc):
            if pow2_x:
                x1 = xc >> log2_n2
                x2 = xc & (n2 - 1)
            else:
                x1 = xc // n2
                x2 = xc - x1 * n2
            if pow2_y:
                y1 = yc >> log2_m2
                y2 = yc & (m2 - 1)
            else:
                y1 = yc // m2
                y2 = yc - y1 * m2
            # (-1)**v sign factors as negate masks (0 / -1), applied via xor/sub
            my1 = -(y1 & 1)
            mx1 = -(x1 & 1)
            mx2 = -(x2 & 1)
            my2 = -(y2 & 1)
            vx = (N1 * y1 + sgn(x1, my1)) * N2M2 + sgn(M2 * x2 + sgn(y2, mx2), my1)
            vy = (M1 * x1 + sgn(y1, mx1)) * M2N2 + sgn(N2 * y2 + sgn(x2, my2), mx1)
            return vx + boff, vy + boff

        vx, vy = keys(x, y)
        vxs, vys = keys(x + shift_x, y + shift_y)
        o_ref[0] = vx
        o_ref[1] = vy
        o_ref[2] = vxs
        o_ref[3] = vys

    return kernel


def _choose_row_tiling(npts: int):
    """Rows = ceil(Npts/128). Tile the rows axis with <= MAX_TILE_ROWS rows per
    step (multiple of 8 for the (8,128) constraint), balancing tiles so padding
    stays small. Small inputs -> one step (no forced split on single-TC chips);
    big inputs -> multi-step parallel grid (v7x's 2 TCs share it)."""
    rows = max(_cdiv(npts, LANE), 1)
    ntiles = _cdiv(rows, MAX_TILE_ROWS)
    r_tile = _round_up(_cdiv(rows, ntiles), 8)
    r_pad = ntiles * r_tile
    return ntiles, r_tile, r_pad


def window_keys_pallas(coords: jnp.ndarray, B_sparse: int, n2: int) -> jnp.ndarray:
    """Run the Pallas key kernel.

    coords: (Npts, 4) int32, columns = [batch, z, y, x].
    Returns (4, Npts) int32, rows = [vx, vy, vx_shift, vy_shift].
    """
    npts = coords.shape[0]
    ntiles, r_tile, r_pad = _choose_row_tiling(npts)
    np_pad = r_pad * LANE

    n1 = int(math.ceil(B_sparse / n2) + 1)
    kernel = _make_keys_kernel(B_sparse, n2, n2, n1, n1)

    @jax.jit
    def run(c):
        # channel-major (3, Np_pad) slab = [batch, y, x]; z is never touched.
        slab = jnp.stack(
            [c[:, 0], c[:, 2], c[:, 3]], axis=0
        ).astype(jnp.int32)
        slab = jnp.pad(slab, ((0, 0), (0, np_pad - npts)))
        slab = slab.reshape(3, r_pad, LANE)          # point p -> (p//128, p%128)
        out = pl.pallas_call(
            kernel,
            out_shape=jax.ShapeDtypeStruct((4, r_pad, LANE), jnp.int32),
            grid=(ntiles,),
            in_specs=[pl.BlockSpec((3, r_tile, LANE), lambda i: (0, i, 0))],
            out_specs=pl.BlockSpec((4, r_tile, LANE), lambda i: (0, i, 0)),
            compiler_params=pltpu.CompilerParams(
                dimension_semantics=("parallel",)),
        )(slab)
        # lane-dense key slab -> (4, Npts); reshape is row-major so point
        # order is preserved and the argsorts consume it directly.
        return out.reshape(4, np_pad)[:, :npts]

    return run(coords)


def flattened_window_mapping(coords, batch_size, *, B, num_slices_per_axis, group_size):
    """JAX/Pallas port of FlattenedWindowMapping.forward.

    coords: (Npts, 4) int array, columns [batch, z, y, x]; points are assumed
    grouped by batch in ascending batch order (contract implied by
    torch.unique + cumsum in the reference).
    Returns (mappings dict of int32 arrays, keys (4, Npts) int32).
    """
    coords = jnp.asarray(coords, jnp.int32)
    group_size = int(group_size)

    # ---- flat2win / win2flat bookkeeping (data-dependent, host-side glue) ----
    # TODO(synk): move this on-device (segment cumsum) if used in a training hot loop.
    coords_np = np.asarray(coords)
    num_per_batch = np.bincount(coords_np[:, 0], minlength=batch_size).astype(np.int64)
    bsi = np.concatenate([[0], np.cumsum(num_per_batch)])
    num_per_batch_p = ((num_per_batch + group_size - 1) // group_size) * group_size
    bsi_p = np.concatenate([[0], np.cumsum(num_per_batch_p)])

    flat2win = np.arange(bsi_p[-1], dtype=np.int64)
    win2flat = np.arange(bsi[-1], dtype=np.int64)
    for i in range(batch_size):
        win2flat[bsi[i]:bsi[i + 1]] += bsi_p[i] - bsi[i]
        if num_per_batch[i] != num_per_batch_p[i]:
            r = num_per_batch[i] % group_size
            flat2win[bsi_p[i + 1] - group_size + r: bsi_p[i + 1]] = \
                flat2win[bsi_p[i + 1] - 2 * group_size + r: bsi_p[i + 1] - group_size]
        flat2win[bsi_p[i]:bsi_p[i + 1]] -= bsi_p[i] - bsi[i]

    mappings = {
        "flat2win": jnp.asarray(flat2win, jnp.int32),
        "win2flat": jnp.asarray(win2flat, jnp.int32),
    }

    # ---- window key computation (Pallas kernel hot path) ----
    # window_shape = (B // N, B // N, 1); sparse_shape = (B, B, 1)  (square,
    # exactly as the module constructs them).
    n2 = B // num_slices_per_axis
    n1 = int(math.ceil(B / n2) + 1)

    # int32 overflow guard (torch reference uses int64 keys).
    max_xy = B - 1 + n2 // 2
    max_1 = max_xy // n2
    max_key = ((2 * n1) * max_1 + max_1) * (2 * n2) * (2 * n2) \
        + (2 * n2) * (n2 - 1) + (n2 - 1) \
        + max(batch_size - 1, 0) * B * B * 10
    assert max_key < 2 ** 31, (
        "window keys overflow int32 for this config; int64 path needed")

    keys = window_keys_pallas(coords, B, n2)   # (4, Npts): vx, vy, vx_s, vy_s

    # argsort permutation == indices returned by torch.sort
    # (jnp.argsort is stable; torch.sort isn't guaranteed stable, so ties may
    #  permute differently — functionally equivalent.)
    mappings["x"] = jnp.argsort(keys[0]).astype(jnp.int32)
    mappings["y"] = jnp.argsort(keys[1]).astype(jnp.int32)
    mappings["x_shift"] = jnp.argsort(keys[2]).astype(jnp.int32)
    mappings["y_shift"] = jnp.argsort(keys[3]).astype(jnp.int32)
    return mappings, keys


def _keys_reference_numpy(coords_np, B, n2):
    """Pure numpy replica of get_window_coors_shift + vx/vy, for verification."""
    n1 = int(np.ceil(B / n2) + 1)
    N2, M2, N1, M1 = 2 * n2, 2 * n2, 2 * n1, 2 * n1
    out = []
    for shifted in (False, True):
        if shifted:
            x = coords_np[:, 3] + n2 // 2
            y = coords_np[:, 2] + n2 // 2
        else:
            x = coords_np[:, 3]
            y = coords_np[:, 2]
        x1, y1, x2, y2 = x // n2, y // n2, x % n2, y % n2
        vx = (N1 * y1 + (-1) ** y1 * x1) * N2 * M2 + (-1) ** y1 * (M2 * x2 + (-1) ** x2 * y2)
        vy = (M1 * x1 + (-1) ** x1 * y1) * M2 * N2 + (-1) ** x1 * (N2 * y2 + (-1) ** y2 * x2)
        vx = vx + coords_np[:, 0] * B * B * 10
        vy = vy + coords_np[:, 0] * B * B * 10
        out += [vx, vy]
    return np.stack(out, axis=0)


if __name__ == "__main__":
    # Module config (small): sparse_shape = (16,16,1), window_shape = (8,8,1)
    B_kw = 16
    N_slices = 2
    group_size = 4
    batch_size = 2

    key = jax.random.PRNGKey(0)
    # counts not multiples of group_size -> exercises the flat2win padding
    # path; 302 points -> 3 lane-rows -> single (8,128)-row tile.
    n_per_batch = [151, 151]
    npts = sum(n_per_batch)
    yx = jax.random.randint(key, (npts, 2), 0, B_kw, dtype=jnp.int32)
    bcol = jnp.concatenate(
        [jnp.full((n,), i, jnp.int32) for i, n in enumerate(n_per_batch)]
    )
    coords = jnp.stack(
        [bcol, jnp.zeros((npts,), jnp.int32), yx[:, 0], yx[:, 1]], axis=1
    )  # (Npts, 4) = [batch, z, y, x]

    mappings, keys = flattened_window_mapping(
        coords, batch_size,
        B=B_kw, num_slices_per_axis=N_slices, group_size=group_size,
    )
    for v in mappings.values():
        jax.block_until_ready(v)
    jax.block_until_ready(keys)

    # verify the Pallas key computation against a numpy reference
    keys_ref = _keys_reference_numpy(np.asarray(coords), B_kw, B_kw // N_slices)
    np.testing.assert_array_equal(np.asarray(keys), keys_ref.astype(np.int32))

    # sanity on flat2win / win2flat shapes
    assert mappings["win2flat"].shape[0] == npts
    assert mappings["flat2win"].shape[0] == sum(
        ((n + group_size - 1) // group_size) * group_size for n in n_per_batch)

    print("KERNEL_OK")
</pallas_src>

<mosaic_0001>
module attributes {stable_mosaic.version = 11 : i64} {
  func.func @kernel(%arg0: i32, %arg1: memref<3x8x128xi32, #tpu.memory_space<vmem>>, %arg2: memref<4x8x128xi32, #tpu.memory_space<vmem>>) attributes {dimension_semantics = [#tpu.dimension_semantics<parallel>], iteration_bounds = array<i64: 1>, scalar_prefetch = 0 : i64, scratch_operands = 0 : i64, tpu.core_type = #tpu.core_type<tc>, window_params = [{transform_indices = @transform_0, window_bounds = array<i64: 3, 8, 128>}, {transform_indices = @transform_1, window_bounds = array<i64: 4, 8, 128>}]} {
    %c0 = arith.constant 0 : index
    %c0_0 = arith.constant 0 : index
    %c0_1 = arith.constant 0 : index
    %0 = vector.load %arg1[%c0, %c0_0, %c0_1] : memref<3x8x128xi32, #tpu.memory_space<vmem>>, vector<1x8x128xi32>
    %1 = vector.shape_cast %0 : vector<1x8x128xi32> to vector<8x128xi32>
    %c1 = arith.constant 1 : index
    %c0_2 = arith.constant 0 : index
    %c0_3 = arith.constant 0 : index
    %2 = vector.load %arg1[%c1, %c0_2, %c0_3] : memref<3x8x128xi32, #tpu.memory_space<vmem>>, vector<1x8x128xi32>
    %3 = vector.shape_cast %2 : vector<1x8x128xi32> to vector<8x128xi32>
    %c2 = arith.constant 2 : index
    %c0_4 = arith.constant 0 : index
    %c0_5 = arith.constant 0 : index
    %4 = vector.load %arg1[%c2, %c0_4, %c0_5] : memref<3x8x128xi32, #tpu.memory_space<vmem>>, vector<1x8x128xi32>
    %5 = vector.shape_cast %4 : vector<1x8x128xi32> to vector<8x128xi32>
    %c2560_i32 = arith.constant 2560 : i32
    %6 = vector.broadcast %c2560_i32 : i32 to vector<8x128xi32>
    %7 = arith.muli %1, %6 : vector<8x128xi32>
    %c3_i32 = arith.constant 3 : i32
    %8 = vector.broadcast %c3_i32 : i32 to vector<8x128xi32>
    %9 = arith.shrsi %5, %8 : vector<8x128xi32>
    %c7_i32 = arith.constant 7 : i32
    %10 = vector.broadcast %c7_i32 : i32 to vector<8x128xi32>
    %11 = arith.andi %5, %10 : vector<8x128xi32>
    %c3_i32_6 = arith.constant 3 : i32
    %12 = vector.broadcast %c3_i32_6 : i32 to vector<8x128xi32>
    %13 = arith.shrsi %3, %12 : vector<8x128xi32>
    %c7_i32_7 = arith.constant 7 : i32
    %14 = vector.broadcast %c7_i32_7 : i32 to vector<8x128xi32>
    %15 = arith.andi %3, %14 : vector<8x128xi32>
    %c1_i32 = arith.constant 1 : i32
    %16 = vector.broadcast %c1_i32 : i32 to vector<8x128xi32>
    %17 = arith.andi %13, %16 : vector<8x128xi32>
    %c0_i32 = arith.constant 0 : i32
    %18 = vector.broadcast %c0_i32 : i32 to vector<8x128xi32>
    %19 = arith.subi %18, %17 : vector<8x128xi32>
    %c1_i32_8 = arith.constant 1 : i32
    %20 = vector.broadcast %c1_i32_8 : i32 to vector<8x128xi32>
    %21 = arith.andi %9, %20 : vector<8x128xi32>
    %c0_i32_9 = arith.constant 0 : i32
    %22 = vector.broadcast %c0_i32_9 : i32 to vector<8x128xi32>
    %23 = arith.subi %22, %21 : vector<8x128xi32>
    %c1_i32_10 = arith.constant 1 : i32
    %24 = vector.broadcast %c1_i32_10 : i32 to vector<8x128xi32>
    %25 = arith.andi %11, %24 : vector<8x128xi32>
    %c0_i32_11 = arith.constant 0 : i32
    %26 = vector.broadcast %c0_i32_11 : i32 to vector<8x128xi32>
    %27 = arith.subi %26, %25 : vector<8x128xi32>
    %c1_i32_12 = arith.constant 1 : i32
    %28 = vector.broadcast %c1_i32_12 : i32 to vector<8x128xi32>
    %29 = arith.andi %15, %28 : vector<8x128xi32>
    %c0_i32_13 = arith.constant 0 : i32
    %30 = vector.broadcast %c0_i32_13 : i32 to vector<8x128xi32>
    %31 = arith.subi %30, %29 : vector<8x128xi32>
    %c6_i32 = arith.constant 6 : i32
    %32 = vector.broadcast %c6_i32 : i32 to vector<8x128xi32>
    %33 = arith.muli %32, %13 : vector<8x128xi32>
    %34 = arith.xori %9, %19 : vector<8x128xi32>
    %35 = arith.subi %34, %19 : vector<8x128xi32>
    %36 = arith.addi %33, %35 : vector<8x128xi32>
    %c256_i32 = arith.constant 256 : i32
    %37 = vector.broadcast %c256_i32 : i32 to vector<8x128xi32>
    %38 = arith.muli %36, %37 : vector<8x128xi32>
    %c16_i32 = arith.constant 16 : i32
    %39 = vector.broadcast %c16_i32 : i32 to vector<8x128xi32>
    %40 = arith.muli %39, %11 : vector<8x128xi32>
    %41 = arith.xori %15, %27 : vector<8x128xi32>
    %42 = arith.subi %41, %27 : vector<8x128xi32>
    %43 = arith.addi %40, %42 : vector<8x128xi32>
    %44 = arith.xori %43, %19 : vector<8x128xi32>
    %45 = arith.subi %44, %19 : vector<8x128xi32>
    %46 = arith.addi %38, %45 : vector<8x128xi32>
    %c6_i32_14 = arith.constant 6 : i32
    %47 = vector.broadcast %c6_i32_14 : i32 to vector<8x128xi32>
    %48 = arith.muli %47, %9 : vector<8x128xi32>
    %49 = arith.xori %13, %23 : vector<8x128xi32>
    %50 = arith.subi %49, %23 : vector<8x128xi32>
    %51 = arith.addi %48, %50 : vector<8x128xi32>
    %c256_i32_15 = arith.constant 256 : i32
    %52 = vector.broadcast %c256_i32_15 : i32 to vector<8x128xi32>
    %53 = arith.muli %51, %52 : vector<8x128xi32>
    %c16_i32_16 = arith.constant 16 : i32
    %54 = vector.broadcast %c16_i32_16 : i32 to vector<8x128xi32>
    %55 = arith.muli %54, %15 : vector<8x128xi32>
    %56 = arith.xori %11, %31 : vector<8x128xi32>
    %57 = arith.subi %56, %31 : vector<8x128xi32>
    %58 = arith.addi %55, %57 : vector<8x128xi32>
    %59 = arith.xori %58, %23 : vector<8x128xi32>
    %60 = arith.subi %59, %23 : vector<8x128xi32>
    %61 = arith.addi %53, %60 : vector<8x128xi32>
    %62 = arith.addi %46, %7 : vector<8x128xi32>
    %63 = arith.addi %61, %7 : vector<8x128xi32>
    %c4_i32 = arith.constant 4 : i32
    %64 = vector.broadcast %c4_i32 : i32 to vector<8x128xi32>
    %65 = arith.addi %5, %64 : vector<8x128xi32>
    %c4_i32_17 = arith.constant 4 : i32
    %66 = vector.broadcast %c4_i32_17 : i32 to vector<8x128xi32>
    %67 = arith.addi %3, %66 : vector<8x128xi32>
    %c3_i32_18 = arith.constant 3 : i32
    %68 = vector.broadcast %c3_i32_18 : i32 to vector<8x128xi32>
    %69 = arith.shrsi %65, %68 : vector<8x128xi32>
    %c7_i32_19 = arith.constant 7 : i32
    %70 = vector.broadcast %c7_i32_19 : i32 to vector<8x128xi32>
    %71 = arith.andi %65, %70 : vector<8x128xi32>
    %c3_i32_20 = arith.constant 3 : i32
    %72 = vector.broadcast %c3_i32_20 : i32 to vector<8x128xi32>
    %73 = arith.shrsi %67, %72 : vector<8x128xi32>
    %c7_i32_21 = arith.constant 7 : i32
    %74 = vector.broadcast %c7_i32_21 : i32 to vector<8x128xi32>
    %75 = arith.andi %67, %74 : vector<8x128xi32>
    %c1_i32_22 = arith.constant 1 : i32
    %76 = vector.broadcast %c1_i32_22 : i32 to vector<8x128xi32>
    %77 = arith.andi %73, %76 : vector<8x128xi32>
    %c0_i32_23 = arith.constant 0 : i32
    %78 = vector.broadcast %c0_i32_23 : i32 to vector<8x128xi32>
    %79 = arith.subi %78, %77 : vector<8x128xi32>
    %c1_i32_24 = arith.constant 1 : i32
    %80 = vector.broadcast %c1_i32_24 : i32 to vector<8x128xi32>
    %81 = arith.andi %69, %80 : vector<8x128xi32>
    %c0_i32_25 = arith.constant 0 : i32
    %82 = vector.broadcast %c0_i32_25 : i32 to vector<8x128xi32>
    %83 = arith.subi %82, %81 : vector<8x128xi32>
    %c1_i32_26 = arith.constant 1 : i32
    %84 = vector.broadcast %c1_i32_26 : i32 to vector<8x128xi32>
    %85 = arith.andi %71, %84 : vector<8x128xi32>
    %c0_i32_27 = arith.constant 0 : i32
    %86 = vector.broadcast %c0_i32_27 : i32 to vector<8x128xi32>
    %87 = arith.subi %86, %85 : vector<8x128xi32>
    %c1_i32_28 = arith.constant 1 : i32
    %88 = vector.broadcast %c1_i32_28 : i32 to vector<8x128xi32>
    %89 = arith.andi %75, %88 : vector<8x128xi32>
    %c0_i32_29 = arith.constant 0 : i32
    %90 = vector.broadcast %c0_i32_29 : i32 to vector<8x128xi32>
    %91 = arith.subi %90, %89 : vector<8x128xi32>
    %c6_i32_30 = arith.constant 6 : i32
    %92 = vector.broadcast %c6_i32_30 : i32 to vector<8x128xi32>
    %93 = arith.muli %92, %73 : vector<8x128xi32>
    %94 = arith.xori %69, %79 : vector<8x128xi32>
    %95 = arith.subi %94, %79 : vector<8x128xi32>
    %96 = arith.addi %93, %95 : vector<8x128xi32>
    %c256_i32_31 = arith.constant 256 : i32
    %97 = vector.broadcast %c256_i32_31 : i32 to vector<8x128xi32>
    %98 = arith.muli %96, %97 : vector<8x128xi32>
    %c16_i32_32 = arith.constant 16 : i32
    %99 = vector.broadcast %c16_i32_32 : i32 to vector<8x128xi32>
    %100 = arith.muli %99, %71 : vector<8x128xi32>
    %101 = arith.xori %75, %87 : vector<8x128xi32>
    %102 = arith.subi %101, %87 : vector<8x128xi32>
    %103 = arith.addi %100, %102 : vector<8x128xi32>
    %104 = arith.xori %103, %79 : vector<8x128xi32>
    %105 = arith.subi %104, %79 : vector<8x128xi32>
    %106 = arith.addi %98, %105 : vector<8x128xi32>
    %c6_i32_33 = arith.constant 6 : i32
    %107 = vector.broadcast %c6_i32_33 : i32 to vector<8x128xi32>
    %108 = arith.muli %107, %69 : vector<8x128xi32>
    %109 = arith.xori %73, %83 : vector<8x128xi32>
    %110 = arith.subi %109, %83 : vector<8x128xi32>
    %111 = arith.addi %108, %110 : vector<8x128xi32>
    %c256_i32_34 = arith.constant 256 : i32
    %112 = vector.broadcast %c256_i32_34 : i32 to vector<8x128xi32>
    %113 = arith.muli %111, %112 : vector<8x128xi32>
    %c16_i32_35 = arith.constant 16 : i32
    %114 = vector.broadcast %c16_i32_35 : i32 to vector<8x128xi32>
    %115 = arith.muli %114, %75 : vector<8x128xi32>
    %116 = arith.xori %71, %91 : vector<8x128xi32>
    %117 = arith.subi %116, %91 : vector<8x128xi32>
    %118 = arith.addi %115, %117 : vector<8x128xi32>
    %119 = arith.xori %118, %83 : vector<8x128xi32>
    %120 = arith.subi %119, %83 : vector<8x128xi32>
    %121 = arith.addi %113, %120 : vector<8x128xi32>
    %122 = arith.addi %106, %7 : vector<8x128xi32>
    %123 = arith.addi %121, %7 : vector<8x128xi32>
    %c0_36 = arith.constant 0 : index
    %c0_37 = arith.constant 0 : index
    %c0_38 = arith.constant 0 : index
    %124 = vector.load %arg2[%c0_36, %c0_37, %c0_38] : memref<4x8x128xi32, #tpu.memory_space<vmem>>, vector<1x8x128xi32>
    %125 = vector.shape_cast %124 : vector<1x8x128xi32> to vector<8x128xi32>
    %126 = vector.shape_cast %62 : vector<8x128xi32> to vector<1x8x128xi32>
    tpu.vector_store %arg2[%c0_36, %c0_37, %c0_38], %126 {strides = array<i32>} : memref<4x8x128xi32, #tpu.memory_space<vmem>>, vector<1x8x128xi32>,
    %c1_39 = arith.constant 1 : index
    %c0_40 = arith.constant 0 : index
    %c0_41 = arith.constant 0 : index
    %127 = vector.load %arg2[%c1_39, %c0_40, %c0_41] : memref<4x8x128xi32, #tpu.memory_space<vmem>>, vector<1x8x128xi32>
    %128 = vector.shape_cast %127 : vector<1x8x128xi32> to vector<8x128xi32>
    %129 = vector.shape_cast %63 : vector<8x128xi32> to vector<1x8x128xi32>
    tpu.vector_store %arg2[%c1_39, %c0_40, %c0_41], %129 {strides = array<i32>} : memref<4x8x128xi32, #tpu.memory_space<vmem>>, vector<1x8x128xi32>,
    %c2_42 = arith.constant 2 : index
    %c0_43 = arith.constant 0 : index
    %c0_44 = arith.constant 0 : index
    %130 = vector.load %arg2[%c2_42, %c0_43, %c0_44] : memref<4x8x128xi32, #tpu.memory_space<vmem>>, vector<1x8x128xi32>
    %131 = vector.shape_cast %130 : vector<1x8x128xi32> to vector<8x128xi32>
    %132 = vector.shape_cast %122 : vector<8x128xi32> to vector<1x8x128xi32>
    tpu.vector_store %arg2[%c2_42, %c0_43, %c0_44], %132 {strides = array<i32>} : memref<4x8x128xi32, #tpu.memory_space<vmem>>, vector<1x8x128xi32>,
    %c3 = arith.constant 3 : index
    %c0_45 = arith.constant 0 : index
    %c0_46 = arith.constant 0 : index
    %133 = vector.load %arg2[%c3, %c0_45, %c0_46] : memref<4x8x128xi32, #tpu.memory_space<vmem>>, vector<1x8x128xi32>
    %134 = vector.shape_cast %133 : vector<1x8x128xi32> to vector<8x128xi32>
    %135 = vector.shape_cast %123 : vector<8x128xi32> to vector<1x8x128xi32>
    tpu.vector_store %arg2[%c3, %c0_45, %c0_46], %135 {strides = array<i32>} : memref<4x8x128xi32, #tpu.memory_space<vmem>>, vector<1x8x128xi32>,
    return
  }
  func.func @transform_0(%arg0: i32) -> (i32, i32, i32) {
    %c0_i32 = arith.constant 0 : i32
    %c0_i32_0 = arith.constant 0 : i32
    %c0_i32_1 = arith.constant 0 : i32
    return %c0_i32, %arg0, %c0_i32_0 : i32, i32, i32
  }
  func.func @transform_1(%arg0: i32) -> (i32, i32, i32) {
    %c0_i32 = arith.constant 0 : i32
    %c0_i32_0 = arith.constant 0 : i32
    %c0_i32_1 = arith.constant 0 : i32
    return %c0_i32, %arg0, %c0_i32_0 : i32, i32, i32
  }
}

</mosaic_0001>

<bundles_post_ra>
// kernel: run.1
= control target key start
LH: loop header
LB: loop body
LE: loop exit
PB: predicated region body
PF: predicated region fallthrough
CT: control target
= control target key end

     0   :  { %s145_s0 = inlined_call_operand.vmem [shape: s32[3,8,128], index: 0, kind: input, shape index: {}]   ;;  %s146_s1 = inlined_call_operand.vmem [shape: s32[4,8,128], index: 1, kind: output, shape index: {}]  }
   0x1   :  { %v8_v0 = vld [vmem:[%s145_s0] sm:$0xff]  ;;  %v103_v1 = vld [vmem:[%s145_s0 + $0x8] sm:$0xff]  ;;  %v104_v2 = vld [vmem:[%s145_s0 + $0x10] sm:$0xff] }
   0x2   :  { %v14_v3 = vshra.s32 %v104_v2, 3  ;;  %v15_v4 = vand.u32 7, %v104_v2  ;;  %v16_v5 = vshra.s32 %v103_v1, 3  ;;  %v127_v6 = vmul.u32 2560, %v8_v0 }
   0x3   :  { %v17_v7 = vand.u32 7, %v103_v1  ;;  %v52_v8 = vadd.s32 4, %v104_v2  ;;  %v53_v9 = vadd.s32 4, %v103_v1 }
   0x4   :  { %v18_v10 = vand.u32 1, %v16_v5  ;;  %v22_v11 = vand.u32 1, %v15_v4  ;;  %v26_v12 = vmul.u32 6, %v16_v5  ;;  %v31_v13 = vmul.u32 16, %v15_v4 }
   0x5   :  { %v20_v14 = vand.u32 1, %v14_v3  ;;  %v24_v15 = vand.u32 1, %v17_v7  ;;  %v38_v16 = vmul.u32 6, %v14_v3  ;;  %v43_v17 = vmul.u32 16, %v17_v7 }
   0x6   :  { %v19_v18 = vsub.s32 0, %v18_v10  ;;  %v23_v19 = vsub.s32 0, %v22_v11  ;;  %v54_v20 = vshra.s32 %v52_v8, 3  ;;  %v55_v21 = vand.u32 7, %v52_v8 }
   0x7   :  { %v21_v22 = vsub.s32 0, %v20_v14  ;;  %v25_v23 = vsub.s32 0, %v24_v15  ;;  %v56_v24 = vshra.s32 %v53_v9, 3  ;;  %v57_v25 = vand.u32 7, %v53_v9 }
   0x8   :  { %v27_v26 = vxor.u32 %v19_v18, %v14_v3  ;;  %v32_v27 = vxor.u32 %v23_v19, %v17_v7  ;;  %v62_v28 = vand.u32 1, %v55_v21  ;;  %v71_v29 = vmul.u32 16, %v55_v21 }
   0x9   :  { %v39_v30 = vxor.u32 %v21_v22, %v16_v5  ;;  %v44_v31 = vxor.u32 %v25_v23, %v15_v4  ;;  %v58_v32 = vand.u32 1, %v56_v24  ;;  %v66_v33 = vmul.u32 6, %v56_v24 }
   0xa   :  { %v28_v34 = vsub.s32 %v27_v26, %v19_v18  ;;  %v33_v35 = vsub.s32 %v32_v27, %v23_v19  ;;  %v63_v36 = vsub.s32 0, %v62_v28  ;;  %v60_v37 = vand.u32 1, %v54_v20 }
   0xb   :  { %v40_v38 = vsub.s32 %v39_v30, %v21_v22  ;;  %v45_v39 = vsub.s32 %v44_v31, %v25_v23  ;;  %v59_v40 = vsub.s32 0, %v58_v32  ;;  %v64_v41 = vand.u32 1, %v57_v25 }
   0xc   :  { %v29_v42 = vadd.s32 %v28_v34, %v26_v12  ;;  %v34_v43 = vadd.s32 %v33_v35, %v31_v13  ;;  %v72_v44 = vxor.u32 %v63_v36, %v57_v25  ;;  %v61_v45 = vsub.s32 0, %v60_v37 }
   0xd   :  { %v41_v46 = vadd.s32 %v40_v38, %v38_v16  ;;  %v46_v47 = vadd.s32 %v45_v39, %v43_v17  ;;  %v67_v48 = vxor.u32 %v59_v40, %v54_v20  ;;  %v65_v49 = vsub.s32 0, %v64_v41 }
   0xe   :  { %v30_v50 = vmul.u32 256, %v29_v42  ;;  %v35_v51 = vxor.u32 %v34_v43, %v19_v18  ;;  %v73_v52 = vsub.s32 %v72_v44, %v63_v36  ;;  %v78_v53 = vmul.u32 6, %v54_v20 }
   0xf   :  { %v42_v54 = vmul.u32 256, %v41_v46  ;;  %v47_v55 = vxor.u32 %v46_v47, %v21_v22  ;;  %v68_v56 = vsub.s32 %v67_v48, %v59_v40  ;;  %v79_v57 = vxor.u32 %v61_v45, %v56_v24 }
  0x10   :  { %v36_v58 = vsub.s32 %v35_v51, %v19_v18  ;;  %v74_v59 = vadd.s32 %v73_v52, %v71_v29  ;;  %v83_v60 = vmul.u32 16, %v57_v25  ;;  %v84_v61 = vxor.u32 %v65_v49, %v55_v21 }
  0x11   :  { %v48_v62 = vsub.s32 %v47_v55, %v21_v22  ;;  %v69_v63 = vadd.s32 %v68_v56, %v66_v33  ;;  %v80_v0 = vsub.s32 %v79_v57, %v61_v45 }
  0x12   :  { %v37_v1 = vadd.s32 %v36_v58, %v30_v50  ;;  %v75_v2 = vxor.u32 %v74_v59, %v59_v40  ;;  %v85_v3 = vsub.s32 %v84_v61, %v65_v49 }
  0x13   :  { %v49_v4 = vadd.s32 %v48_v62, %v42_v54  ;;  %v70_v5 = vmul.u32 256, %v69_v63  ;;  %v81_v7 = vadd.s32 %v80_v0, %v78_v53 }
  0x14   :  { %v50_v8 = vadd.s32 %v37_v1, %v127_v6  ;;  %v76_v9 = vsub.s32 %v75_v2, %v59_v40  ;;  %v86_v10 = vadd.s32 %v85_v3, %v83_v60 }
  0x15   :  { %v51_v11 = vadd.s32 %v49_v4, %v127_v6  ;;  %v82_v13 = vmul.u32 256, %v81_v7 }
  0x16   :  { %92 = vst [vmem:[%s146_s1] sm:$0xff] %v50_v8  ;;  %v77_v12 = vadd.s32 %v76_v9, %v70_v5  ;;  %v87_v14 = vxor.u32 %v86_v10, %v61_v45 }
  0x17   :  { %105 = vst [vmem:[%s146_s1 + $0x8] sm:$0xff] %v51_v11 }
  0x18   :  { %v90_v15 = vadd.s32 %v77_v12, %v127_v6  ;;  %v88_v16 = vsub.s32 %v87_v14, %v61_v45 }
  0x1a   :  { %106 = vst [vmem:[%s146_s1 + $0x10] sm:$0xff] %v90_v15  ;;  %v89_v17 = vadd.s32 %v88_v16, %v82_v13 }
  0x1c   :  { %v91_v18 = vadd.s32 %v89_v17, %v127_v6 }
  0x1e   :  { %107 = vst [vmem:[%s146_s1 + $0x18] sm:$0xff] %v91_v18 }

</bundles_post_ra>
